<compile_context>
chip_gen: v7x
topology: tpu7x:2x2x1
jax: 0.10.0
libtpu: 0.0.40
codegen_flags: <defaults>
</compile_context>

<pallas_src>
import functools
import math

import jax
import jax.numpy as jnp
from jax.experimental import pallas as pl
from jax.experimental.pallas import tpu as pltpu


def _round_up(x, m):
    return ((x + m - 1) // m) * m


def _dice_sums_kernel(score_ref, target_ref, out_ref):
    """One (rows, TN) tile of the per-class reduction.

    score_ref / target_ref : (rows, TN) tiles in native dtype (cast in-kernel)
    out_ref                : (rows, 3) f32 block, resident across the j axis
                             columns = [sum(s*t), sum(t*t), sum(s*s)]
    """
    j = pl.program_id(1)

    @pl.when(j == 0)
    def _():
        out_ref[...] = jnp.zeros_like(out_ref)

    s = score_ref[...].astype(jnp.float32)
    t = target_ref[...].astype(jnp.float32)

    partial = jnp.concatenate(
        [
            jnp.sum(s * t, axis=-1, keepdims=True),
            jnp.sum(t * t, axis=-1, keepdims=True),
            jnp.sum(s * s, axis=-1, keepdims=True),
        ],
        axis=-1,
    )
    out_ref[...] += partial


# 2 inputs x 2 pipeline buffers must fit in this budget (safe on v5e/v6e/v7x).
_VMEM_INPUT_BUDGET = 24 * 1024 * 1024
_VMEM_LIMIT_BYTES = 48 * 1024 * 1024
_MAX_TN = 512 * 1024


def _per_class_sums(score_bcn, target_bcn, n_classes):
    """score/target: (B, C, R) with R = H*W. Returns (C, 3) f32 per-class sums."""
    B, C, R = score_bcn.shape
    itemsize = max(jnp.dtype(score_bcn.dtype).itemsize,
                   jnp.dtype(target_bcn.dtype).itemsize)

    # Fold part of the reduction axis into sublanes so small C does not waste
    # the 8-sublane dimension of every vreg / VMEM tile.
    k = 8 // math.gcd(C, 8)
    if R % k != 0:
        k = 1
    rows = C * k
    L = R // k

    score = score_bcn.reshape(B, rows, L)
    target = target_bcn.reshape(B, rows, L)

    # Largest lane tile that keeps double-buffered inputs inside the budget.
    rows_vmem = _round_up(rows, 8)
    max_tn = _VMEM_INPUT_BUDGET // (4 * rows_vmem * itemsize)
    max_tn = max(128, min(_MAX_TN, (max_tn // 128) * 128))
    TN = min(max_tn, _round_up(L, 128))

    # Zero-pad the reduction axis; zeros contribute 0 to all three sums.
    L_pad = _round_up(L, TN)
    if L_pad != L:
        pad = L_pad - L
        score = jnp.pad(score, ((0, 0), (0, 0), (0, pad)))
        target = jnp.pad(target, ((0, 0), (0, 0), (0, pad)))

    grid = (B, L_pad // TN)

    sums = pl.pallas_call(
        _dice_sums_kernel,
        out_shape=jax.ShapeDtypeStruct((B, rows, 3), jnp.float32),
        grid_spec=pltpu.PrefetchScalarGridSpec(
            num_scalar_prefetch=0,
            grid=grid,
            in_specs=[
                pl.BlockSpec((pl.Squeezed(), rows, TN), lambda b, j: (b, 0, j)),
                pl.BlockSpec((pl.Squeezed(), rows, TN), lambda b, j: (b, 0, j)),
            ],
            out_specs=pl.BlockSpec((pl.Squeezed(), rows, 3),
                                   lambda b, j: (b, 0, 0)),
        ),
        compiler_params=pltpu.CompilerParams(
            dimension_semantics=("parallel", "arbitrary"),
            vmem_limit_bytes=_VMEM_LIMIT_BYTES,
        ),
    )(score, target)

    # Undo the batch and sublane folding: (B, C*k, 3) -> (C, 3).
    return sums.reshape(B, C, k, 3).sum(axis=(0, 2))


@functools.partial(jax.jit, static_argnames=("n_classes", "softmax"))
def dice_loss(inputs, target, n_classes, weight=None, softmax=False):
    """Matches DiceLoss.forward(inputs, target, weight, softmax).

    inputs, target: (B, C, H, W), same shape (target already one-hot).
    Returns scalar f32 loss.
    """
    if softmax:
        inputs = jax.nn.softmax(inputs, axis=1)
    assert inputs.shape == target.shape, (
        "predict {} & target {} shape do not match".format(
            inputs.shape, target.shape))
    B, C, H, W = inputs.shape
    assert C == n_classes
    R = H * W

    # Free reshapes only (no transpose, no dtype upcast in HBM).
    score = inputs.reshape(B, C, R)
    tgt = target.reshape(B, C, R)

    sums = _per_class_sums(score, tgt, n_classes)  # (C, 3)
    intersect = sums[:, 0]
    y_sum = sums[:, 1]
    z_sum = sums[:, 2]

    smooth = 1e-05
    dice = (2.0 * intersect + smooth) / (z_sum + y_sum + smooth)
    class_dice_loss = 1.0 - dice  # per-class dice loss, like _dice_loss

    if weight is None:
        weight = jnp.ones((n_classes,), jnp.float32)
    else:
        weight = jnp.asarray(weight, jnp.float32)

    return jnp.sum(class_dice_loss * weight) / n_classes


def _dice_loss_ref(inputs, target, n_classes, weight=None, softmax=False):
    """Pure-JAX reference mirroring the PyTorch module, for verification."""
    if softmax:
        inputs = jax.nn.softmax(inputs, axis=1)
    if weight is None:
        weight = [1.0] * n_classes
    smooth = 1e-05
    loss = 0.0
    for i in range(n_classes):
        score = inputs[:, i].astype(jnp.float32)
        tgt = target[:, i].astype(jnp.float32)
        intersect = jnp.sum(score * tgt)
        y_sum = jnp.sum(tgt * tgt)
        z_sum = jnp.sum(score * score)
        d = 1.0 - (2.0 * intersect + smooth) / (z_sum + y_sum + smooth)
        loss = loss + d * weight[i]
    return loss / n_classes


if __name__ == "__main__":
    B, C, H, W = 2, 4, 16, 16
    n_classes = C

    key = jax.random.PRNGKey(0)
    k_logits, k_labels = jax.random.split(key)

    # Predicted logits (softmax applied inside forward via softmax=True).
    logits = jax.random.normal(k_logits, (B, C, H, W), dtype=jnp.float32)

    # Integer labels -> one-hot target, shape (B, C, H, W) (NCHW), as the
    # PyTorch _one_hot_encoder would produce.
    labels = jax.random.randint(k_labels, (B, H, W), 0, n_classes)
    target = jnp.transpose(
        jax.nn.one_hot(labels, n_classes, dtype=jnp.float32), (0, 3, 1, 2)
    )

    loss = dice_loss(logits, target, n_classes, softmax=True)
    loss = jax.block_until_ready(loss)

    ref = _dice_loss_ref(logits, target, n_classes, softmax=True)
    assert jnp.allclose(loss, ref, rtol=1e-5, atol=1e-6), (loss, ref)

    print("KERNEL_OK")
</pallas_src>

<mosaic_0001>
module attributes {stable_mosaic.version = 11 : i64} {
  func.func @_dice_sums_kernel(%arg0: i32, %arg1: i32, %arg2: memref<1x8x128xf32, #tpu.memory_space<vmem>>, %arg3: memref<1x8x128xf32, #tpu.memory_space<vmem>>, %arg4: memref<1x8x3xf32, #tpu.memory_space<vmem>>) attributes {dimension_semantics = [#tpu.dimension_semantics<parallel>, #tpu.dimension_semantics<arbitrary>], iteration_bounds = array<i64: 2, 1>, scalar_prefetch = 0 : i64, scratch_operands = 0 : i64, tpu.core_type = #tpu.core_type<tc>, window_params = [{transform_indices = @transform_0, window_bounds = array<i64: 1, 8, 128>}, {transform_indices = @transform_1, window_bounds = array<i64: 1, 8, 128>}, {transform_indices = @transform_2, window_bounds = array<i64: 1, 8, 3>}]} {
    %c0_i32 = arith.constant 0 : i32
    %0 = arith.cmpi eq, %arg1, %c0_i32 : i32
    %1 = arith.extui %0 : i1 to i32
    %c0_i32_0 = arith.constant 0 : i32
    %2 = arith.cmpi ne, %1, %c0_i32_0 : i32
    scf.if %2 {
      %cst_14 = arith.constant 0.000000e+00 : f32
      %23 = vector.broadcast %cst_14 : f32 to vector<8x3xf32>
      %c0_15 = arith.constant 0 : index
      %c0_16 = arith.constant 0 : index
      %c0_17 = arith.constant 0 : index
      %24 = vector.load %arg4[%c0_15, %c0_16, %c0_17] : memref<1x8x3xf32, #tpu.memory_space<vmem>>, vector<1x8x3xf32>
      %25 = vector.shape_cast %24 : vector<1x8x3xf32> to vector<8x3xf32>
      %26 = vector.shape_cast %23 : vector<8x3xf32> to vector<1x8x3xf32>
      tpu.vector_store %arg4[%c0_15, %c0_16, %c0_17], %26 {strides = array<i32>} : memref<1x8x3xf32, #tpu.memory_space<vmem>>, vector<1x8x3xf32>,
    } else {
    }
    %c0 = arith.constant 0 : index
    %c0_1 = arith.constant 0 : index
    %c0_2 = arith.constant 0 : index
    %3 = vector.load %arg2[%c0, %c0_1, %c0_2] : memref<1x8x128xf32, #tpu.memory_space<vmem>>, vector<1x8x128xf32>
    %4 = vector.shape_cast %3 : vector<1x8x128xf32> to vector<8x128xf32>
    %c0_3 = arith.constant 0 : index
    %c0_4 = arith.constant 0 : index
    %c0_5 = arith.constant 0 : index
    %5 = vector.load %arg3[%c0_3, %c0_4, %c0_5] : memref<1x8x128xf32, #tpu.memory_space<vmem>>, vector<1x8x128xf32>
    %6 = vector.shape_cast %5 : vector<1x8x128xf32> to vector<8x128xf32>
    %7 = arith.mulf %4, %6 : vector<8x128xf32>
    %cst = arith.constant dense<0.000000e+00> : vector<8xf32>
    %8 = vector.multi_reduction <add>, %7, %cst [1] : vector<8x128xf32> to vector<8xf32>
    %9 = vector.shape_cast %8 : vector<8xf32> to vector<8x1xf32>
    %10 = arith.mulf %6, %6 : vector<8x128xf32>
    %cst_6 = arith.constant dense<0.000000e+00> : vector<8xf32>
    %11 = vector.multi_reduction <add>, %10, %cst_6 [1] : vector<8x128xf32> to vector<8xf32>
    %12 = vector.shape_cast %11 : vector<8xf32> to vector<8x1xf32>
    %13 = arith.mulf %4, %4 : vector<8x128xf32>
    %cst_7 = arith.constant dense<0.000000e+00> : vector<8xf32>
    %14 = vector.multi_reduction <add>, %13, %cst_7 [1] : vector<8x128xf32> to vector<8xf32>
    %15 = vector.shape_cast %14 : vector<8xf32> to vector<8x1xf32>
    %16 = tpu.concatenate %9, %12, %15 in 1 : vector<8x1xf32>, vector<8x1xf32>, vector<8x1xf32> -> vector<8x3xf32>
    %c0_8 = arith.constant 0 : index
    %c0_9 = arith.constant 0 : index
    %c0_10 = arith.constant 0 : index
    %17 = vector.load %arg4[%c0_8, %c0_9, %c0_10] : memref<1x8x3xf32, #tpu.memory_space<vmem>>, vector<1x8x3xf32>
    %18 = vector.shape_cast %17 : vector<1x8x3xf32> to vector<8x3xf32>
    %19 = arith.addf %18, %16 : vector<8x3xf32>
    %c0_11 = arith.constant 0 : index
    %c0_12 = arith.constant 0 : index
    %c0_13 = arith.constant 0 : index
    %20 = vector.load %arg4[%c0_11, %c0_12, %c0_13] : memref<1x8x3xf32, #tpu.memory_space<vmem>>, vector<1x8x3xf32>
    %21 = vector.shape_cast %20 : vector<1x8x3xf32> to vector<8x3xf32>
    %22 = vector.shape_cast %19 : vector<8x3xf32> to vector<1x8x3xf32>
    tpu.vector_store %arg4[%c0_11, %c0_12, %c0_13], %22 {strides = array<i32>} : memref<1x8x3xf32, #tpu.memory_space<vmem>>, vector<1x8x3xf32>,
    return
  }
  func.func @transform_0(%arg0: i32, %arg1: i32) -> (i32, i32, i32) {
    %c0_i32 = arith.constant 0 : i32
    %c0_i32_0 = arith.constant 0 : i32
    return %arg0, %c0_i32, %arg1 : i32, i32, i32
  }
  func.func @transform_1(%arg0: i32, %arg1: i32) -> (i32, i32, i32) {
    %c0_i32 = arith.constant 0 : i32
    %c0_i32_0 = arith.constant 0 : i32
    return %arg0, %c0_i32, %arg1 : i32, i32, i32
  }
  func.func @transform_2(%arg0: i32, %arg1: i32) -> (i32, i32, i32) {
    %c0_i32 = arith.constant 0 : i32
    %c0_i32_0 = arith.constant 0 : i32
    %c0_i32_1 = arith.constant 0 : i32
    return %arg0, %c0_i32, %c0_i32_0 : i32, i32, i32
  }
}

</mosaic_0001>

<bundles_post_ra>
// kernel: dice_loss.1
= control target key start
LH: loop header
LB: loop body
LE: loop exit
PB: predicated region body
PF: predicated region fallthrough
CT: control target
= control target key end

     0   :  { %s369_s9 = smov 0   ;;  %s371_s10 = smov 0   ;;  %s407_s0 = inlined_call_operand.vmem [shape: f32[2,8,128], index: 0, kind: input, shape index: {}]   ;;  %s408_s1 = inlined_call_operand.vmem [shape: f32[2,8,128], index: 1, kind: input, shape index: {}]   ;;  %s409_s2 = inlined_call_operand.vmem [shape: f32[2,8,3], index: 2, kind: output, shape index: {}]  }
   0x1   :  { %s373_s11 = smov 0  }
   0x2 LB: > { %s24_s12 = sadd.s32 1, %s347_s10  ;;  %p298_p0 = scmp.ge.s32.totalorder %s351_s11, 1  ;;  %s351_s11 = sphi %s373_s11, %s12_s11   ;;  %s347_s10 = sphi %s371_s10, %s411_s10   ;;  %s343_s9 = sphi %s369_s9, %s410_s9  }
   0x3   : > { %p26_p1 = scmp.ge.s32.totalorder %s24_s12, 2  ;;  %p142_p2 = scmp.lt.s32.totalorder %s351_s11, 3 }
   0x5   : > { %s413_s12 = smov (%p26_p1, %s24_s12), 0  ;;  %p143_p3 = pnand %p298_p0, %p142_p2 }
   0x6   : > { %p172_p4 = scmp.lt.s32.totalorder (!%p143_p3), %s343_s9, 1  ;;  %vm194_vm0 = vcmask (!%p143_p3), 23552   ;;  %v353_v2 = vmov (!%p143_p3), 0.0   ;;  %vm207_vm1 = vcmask (!%p143_p3), 7168   ;;  %vm209_vm2 = vcmask (!%p143_p3), 15360  }
   0x7   : > { %146 = sbr.rel (%p143_p3) target bundleno = 172 (0xac), region = 28 }
   0xe   : > { %s415_s9 = smov (!%p172_p4, %s343_s9), 1 }
   0xf   : > { %s299_s13 = sshll.u32 %s415_s9, 3 }
  0x10   : > { %s178_s16 = scalar_lea.vmem %s407_s0, %s299_s13  ;;  %s185_s19 = scalar_lea.vmem %s408_s1, %s299_s13 }
  0x11   : > { %s189_s22 = scalar_lea.vmem %s409_s2, %s299_s13  ;;  %v196_v0 = vld [vmem:[%s178_s16] sm:$0xff] }
  0x12   : > { %v197_v1 = vld [vmem:[%s185_s19] sm:$0xff]  ;;  %195 = vst.msk [vmem:[%s189_s22] sm:$0xff] %vm194_vm0, %v353_v2  ;;  %v204_v4 = vmul.f32 %v196_v0, %v196_v0 }
  0x13   : > { %v198_v3 = vmul.f32 %v197_v1, %v196_v0  ;;  %v201_v5 = vmul.f32 %v197_v1, %v197_v1 }
  0x14   : > { %205 = vadd.xlane.f32.xlu1 %v204_v4 }
  0x15   : > { %199 = vadd.xlane.f32.xlu0 %v198_v3 }
  0x19   : > { %202 = vadd.xlane.f32.xlu0 %v201_v5  ;;  %v211_v9 = vld [vmem:[%s189_s22] sm:$0xff] }
  0xa1   : > { %v206_v7 = vpop.xlane.xlu1 %205 }
  0xa2   : > { %v200_v6 = vpop.xlane.xlu0 %199 }
  0xa6   : > { %v203_v8 = vpop.xlane.xlu0 %202 }
  0xa7   : > { %v208_v10 = vsel %vm207_vm1, %v200_v6, %v203_v8 }
  0xa8   : > { %v210_v11 = vsel %vm209_vm2, %v208_v10, %v206_v7 }
  0xa9   : > { %v212_v12 = vadd.f32 %v211_v9, %v210_v11 }
  0xab   : > { %214 = vst.msk [vmem:[%s189_s22] sm:$0xff] %vm194_vm0, %v212_v12 }
  0xac PF: > { %s12_s11 = sadd.s32 1, %s351_s11   ;;  %s410_s9 = smov %s347_s10 }
  0xad   : > { %p9_p5 = scmp.ge.s32.totalorder %s12_s11, 4   ;;  %s411_s10 = smov %s413_s12 }
  0xaf   :  { %11 = sbr.rel (!%p9_p5) target bundleno = 2 (0x2), region = 65 }

</bundles_post_ra>
